<compile_context>
chip_gen: v5e
topology: v5e:2x2
jax: 0.10.0
libtpu: 0.0.40
codegen_flags: <defaults>
</compile_context>

<pallas_src>
import functools

import jax
import jax.numpy as jnp
from jax.experimental import pallas as pl
from jax.experimental.pallas import tpu as pltpu

LANE = 128            # lane-dense output row width
MAX_TASK_BLOCK = 128  # max tasks processed per grid step


def _meta_block_kernel(data_ref, w1_ref, b1_ref, w2_ref, b2_ref, w3r_ref,
                       b3_ref, loss_ref, *, inner_lr, K, Q, tasks, t_blk):
    f32 = jnp.float32
    data = data_ref[...]            # (T, S8, 4): lanes = [kx, ky, qx, qy]
    kx = data[:, :K, 0:1]           # (T, K, 1)
    ky = data[:, :K, 1:2]           # (T, K, 1)
    qx = data[:, :Q, 2:3]           # (T, Q, 1)
    qy = data[:, :Q, 3:4]           # (T, Q, 1)

    w1 = w1_ref[...]                # (1, H)
    b1 = b1_ref[...]                # (1, H)
    w2 = w2_ref[...]                # (H, H)
    b2 = b2_ref[...]                # (1, H)
    w3r = w3r_ref[...]              # (1, H)  == w3.T (pre-transposed on host)
    b3 = b3_ref[...]                # (1, 1)

    # ---- support forward: layers 1 & 3 are rank-1 -> VPU broadcast/reduce --
    z1 = kx * w1[None, :, :] + b1[None, :, :]                        # (T,K,H)
    h1 = jnp.maximum(z1, 0.0)
    z2 = jnp.einsum('tkh,hg->tkg', h1, w2,
                    preferred_element_type=f32) + b2[None, :, :]     # (T,K,H)
    h2 = jnp.maximum(z2, 0.0)
    pred = jnp.sum(h2 * w3r[None, :, :], axis=-1,
                   keepdims=True) + b3[None, :, :]                   # (T,K,1)

    # ---- manual backprop of lossk = mean((pred - ky)^2) --------------------
    d_out = (2.0 / K) * (pred - ky)                                  # (T,K,1)
    d_w3 = jnp.sum(h2 * d_out, axis=1, keepdims=True)                # (T,1,H)
    d_b3 = jnp.sum(d_out, axis=1, keepdims=True)                     # (T,1,1)
    d_h2 = d_out * w3r[None, :, :]                                   # (T,K,H)
    d_z2 = jnp.where(z2 > 0.0, d_h2, 0.0)                            # (T,K,H)
    d_b2 = jnp.sum(d_z2, axis=1, keepdims=True)                      # (T,1,H)
    d_h1 = jnp.einsum('tkg,hg->tkh', d_z2, w2,
                      preferred_element_type=f32)                    # (T,K,H)
    d_z1 = jnp.where(z1 > 0.0, d_h1, 0.0)
    d_w1 = jnp.sum(kx * d_z1, axis=1, keepdims=True)                 # (T,1,H)
    d_b1 = jnp.sum(d_z1, axis=1, keepdims=True)                      # (T,1,H)

    # ---- inner SGD step (fast weights; fw2 folded algebraically below) -----
    fw1 = w1[None, :, :] - inner_lr * d_w1                           # (T,1,H)
    fb1 = b1[None, :, :] - inner_lr * d_b1                           # (T,1,H)
    fb2 = b2[None, :, :] - inner_lr * d_b2                           # (T,1,H)
    fw3 = w3r[None, :, :] - inner_lr * d_w3                          # (T,1,H)
    fb3 = b3[None, :, :] - inner_lr * d_b3                           # (T,1,1)

    # ---- query forward with fast weights -----------------------------------
    qh1 = jnp.maximum(qx * fw1 + fb1, 0.0)                           # (T,Q,H)
    # qh1 @ fw2  =  qh1 @ w2  -  inner_lr * (qh1 @ h1^T) @ d_z2
    # (no (T,H,H) tensor, no per-task (H,H) weight matmuls)
    qz2_shared = jnp.einsum('tqh,hg->tqg', qh1, w2,
                            preferred_element_type=f32)              # (T,Q,H)
    a = jnp.einsum('tqh,tkh->tqk', qh1, h1,
                   preferred_element_type=f32)                       # (T,Q,K)
    corr = jnp.einsum('tqk,tkg->tqg', a, d_z2,
                      preferred_element_type=f32)                    # (T,Q,H)
    qh2 = jnp.maximum(qz2_shared - inner_lr * corr + fb2, 0.0)       # (T,Q,H)
    qpred = jnp.sum(qh2 * fw3, axis=-1, keepdims=True) + fb3         # (T,Q,1)

    qdiff = qpred - qy
    lossq = jnp.sum(qdiff * qdiff, axis=1, keepdims=True) * (1.0 / Q)  # (T,1,1)

    # ---- mask padded tasks, emit one partial sum per grid step -------------
    base = pl.program_id(0) * t_blk
    tid = jax.lax.broadcasted_iota(jnp.int32, lossq.shape, 0) + base
    lossq = jnp.where(tid < tasks, lossq, 0.0)
    block_sum = jnp.sum(lossq, axis=0, keepdims=True)                # (1,1,1)
    loss_ref[...] = jnp.broadcast_to(block_sum, loss_ref.shape)      # (1,1,128)


def meta_forward_pallas(k_x, k_y, q_x, q_y, params, inner_lr=0.01):
    tasks, K, din = k_x.shape
    Q = q_x.shape[1]
    H = params["w1"].shape[1]
    assert din == 1 and params["w3"].shape == (H, 1)

    # Task block: large enough to amortize per-step overhead, and >= 2 blocks
    # whenever tasks > 1 so both v7x TensorCores get work.
    if tasks > 1:
        t_blk = min(MAX_TASK_BLOCK, (tasks + 1) // 2)
    else:
        t_blk = 1
    n_blk = (tasks + t_blk - 1) // t_blk
    tasks_pad = n_blk * t_blk

    S = max(K, Q)
    S8 = ((S + 7) // 8) * 8

    # Single packed, task-major input: (tasks_pad, S8, 4) with last-dim lanes
    # [kx, ky, qx, qy] -> one DMA per grid step, no (K, 1) lane-size-1 blocks.
    packed = jnp.zeros((tasks_pad, S8, 4), jnp.float32)
    packed = packed.at[:tasks, :K, 0].set(k_x[..., 0])
    packed = packed.at[:tasks, :K, 1].set(k_y[..., 0])
    packed = packed.at[:tasks, :Q, 2].set(q_x[..., 0])
    packed = packed.at[:tasks, :Q, 3].set(q_y[..., 0])

    w3r = params["w3"].T   # (1, H): row form, so the kernel never transposes

    def const_spec(shape):
        return pl.BlockSpec(shape, lambda i: (0, 0))

    out = pl.pallas_call(
        functools.partial(_meta_block_kernel, inner_lr=inner_lr,
                          K=K, Q=Q, tasks=tasks, t_blk=t_blk),
        out_shape=jax.ShapeDtypeStruct((n_blk, 1, LANE), jnp.float32),
        grid_spec=pltpu.PrefetchScalarGridSpec(
            num_scalar_prefetch=0,
            grid=(n_blk,),
            in_specs=[
                pl.BlockSpec((t_blk, S8, 4), lambda i: (i, 0, 0)),  # packed data
                const_spec((1, H)),   # w1
                const_spec((1, H)),   # b1
                const_spec((H, H)),   # w2
                const_spec((1, H)),   # b2
                const_spec((1, H)),   # w3 (row form)
                const_spec((1, 1)),   # b3
            ],
            out_specs=pl.BlockSpec((1, 1, LANE), lambda i: (i, 0, 0)),
        ),
        compiler_params=pltpu.CompilerParams(
            dimension_semantics=("parallel",)),
    )(packed, params["w1"], params["b1"], params["w2"], params["b2"],
      w3r, params["b3"])

    return out[:, 0, 0].sum() / tasks


# ------------------------- pure-JAX reference ---------------------------
def _net(x, w):
    h = jnp.maximum(x @ w["w1"] + w["b1"], 0.0)
    h = jnp.maximum(h @ w["w2"] + w["b2"], 0.0)
    return h @ w["w3"] + w["b3"]


def meta_forward_ref(k_x, k_y, q_x, q_y, params, inner_lr=0.01):
    def task_loss(kx, ky, qx, qy):
        inner = lambda p: jnp.mean((_net(kx, p) - ky) ** 2)
        g = jax.grad(inner)(params)
        fast = {k: params[k] - inner_lr * g[k] for k in params}
        return jnp.mean((_net(qx, fast) - qy) ** 2)

    return jax.vmap(task_loss)(k_x, k_y, q_x, q_y).mean()


# ----------------------------- main -------------------------------------
if __name__ == "__main__":
    tasks, K, Q, H = 4, 8, 8, 32   # small config: hidden_dims=[32, 32]
    inner_lr = 0.01

    key = jax.random.PRNGKey(0)
    k_w1, k_w2, k_w3, k_kx, k_ky, k_qx, k_qy = jax.random.split(key, 7)

    # truncated_normal(std=0.01) init for weights, zeros for biases
    params = {
        "w1": 0.01 * jax.random.truncated_normal(k_w1, -2.0, 2.0, (1, H), jnp.float32),
        "b1": jnp.zeros((1, H), jnp.float32),
        "w2": 0.01 * jax.random.truncated_normal(k_w2, -2.0, 2.0, (H, H), jnp.float32),
        "b2": jnp.zeros((1, H), jnp.float32),
        "w3": 0.01 * jax.random.truncated_normal(k_w3, -2.0, 2.0, (H, 1), jnp.float32),
        "b3": jnp.zeros((1, 1), jnp.float32),
    }

    k_x = jax.random.uniform(k_kx, (tasks, K, 1), jnp.float32, -5.0, 5.0)
    k_y = jnp.sin(k_x) + 0.1 * jax.random.normal(k_ky, (tasks, K, 1), jnp.float32)
    q_x = jax.random.uniform(k_qx, (tasks, Q, 1), jnp.float32, -5.0, 5.0)
    q_y = jnp.sin(q_x) + 0.1 * jax.random.normal(k_qy, (tasks, Q, 1), jnp.float32)

    loss = meta_forward_pallas(k_x, k_y, q_x, q_y, params, inner_lr)
    loss = jax.block_until_ready(loss)

    ref = jax.block_until_ready(
        meta_forward_ref(k_x, k_y, q_x, q_y, params, inner_lr))

    assert jnp.allclose(loss, ref, rtol=1e-4, atol=1e-5), (loss, ref)
    print("KERNEL_OK")
</pallas_src>

<mosaic_0001>
module attributes {stable_mosaic.version = 11 : i64} {
  func.func @_meta_block_kernel(%arg0: i32, %arg1: memref<2x8x4xf32, #tpu.memory_space<vmem>>, %arg2: memref<1x32xf32, #tpu.memory_space<vmem>>, %arg3: memref<1x32xf32, #tpu.memory_space<vmem>>, %arg4: memref<32x32xf32, #tpu.memory_space<vmem>>, %arg5: memref<1x32xf32, #tpu.memory_space<vmem>>, %arg6: memref<1x32xf32, #tpu.memory_space<vmem>>, %arg7: memref<1x1xf32, #tpu.memory_space<vmem>>, %arg8: memref<1x1x128xf32, #tpu.memory_space<vmem>>) attributes {dimension_semantics = [#tpu.dimension_semantics<parallel>], iteration_bounds = array<i64: 2>, scalar_prefetch = 0 : i64, scratch_operands = 0 : i64, tpu.core_type = #tpu.core_type<tc>, window_params = [{transform_indices = @transform_0, window_bounds = array<i64: 2, 8, 4>}, {pipeline_mode = #tpu.pipeline_mode<synchronous>, transform_indices = @transform_1, window_bounds = array<i64: 1, 32>}, {pipeline_mode = #tpu.pipeline_mode<synchronous>, transform_indices = @transform_2, window_bounds = array<i64: 1, 32>}, {pipeline_mode = #tpu.pipeline_mode<synchronous>, transform_indices = @transform_3, window_bounds = array<i64: 32, 32>}, {pipeline_mode = #tpu.pipeline_mode<synchronous>, transform_indices = @transform_4, window_bounds = array<i64: 1, 32>}, {pipeline_mode = #tpu.pipeline_mode<synchronous>, transform_indices = @transform_5, window_bounds = array<i64: 1, 32>}, {pipeline_mode = #tpu.pipeline_mode<synchronous>, transform_indices = @transform_6, window_bounds = array<i64: 1, 1>}, {transform_indices = @transform_7, window_bounds = array<i64: 1, 1, 128>}]} {
    %c0 = arith.constant 0 : index
    %c0_0 = arith.constant 0 : index
    %c0_1 = arith.constant 0 : index
    %0 = vector.load %arg1[%c0, %c0_0, %c0_1] : memref<2x8x4xf32, #tpu.memory_space<vmem>>, vector<2x8x4xf32>
    %1 = vector.extract_strided_slice %0 {offsets = [0, 0, 0], sizes = [2, 8, 1], strides = [1, 1, 1]} : vector<2x8x4xf32> to vector<2x8x1xf32>
    %2 = vector.extract_strided_slice %0 {offsets = [0, 0, 1], sizes = [2, 8, 1], strides = [1, 1, 1]} : vector<2x8x4xf32> to vector<2x8x1xf32>
    %3 = vector.extract_strided_slice %0 {offsets = [0, 0, 2], sizes = [2, 8, 1], strides = [1, 1, 1]} : vector<2x8x4xf32> to vector<2x8x1xf32>
    %4 = vector.extract_strided_slice %0 {offsets = [0, 0, 3], sizes = [2, 8, 1], strides = [1, 1, 1]} : vector<2x8x4xf32> to vector<2x8x1xf32>
    %c0_2 = arith.constant 0 : index
    %c0_3 = arith.constant 0 : index
    %5 = vector.load %arg2[%c0_2, %c0_3] : memref<1x32xf32, #tpu.memory_space<vmem>>, vector<1x32xf32>
    %c0_4 = arith.constant 0 : index
    %c0_5 = arith.constant 0 : index
    %6 = vector.load %arg3[%c0_4, %c0_5] : memref<1x32xf32, #tpu.memory_space<vmem>>, vector<1x32xf32>
    %c0_6 = arith.constant 0 : index
    %c0_7 = arith.constant 0 : index
    %7 = vector.load %arg4[%c0_6, %c0_7] : memref<32x32xf32, #tpu.memory_space<vmem>>, vector<32x32xf32>
    %c0_8 = arith.constant 0 : index
    %c0_9 = arith.constant 0 : index
    %8 = vector.load %arg5[%c0_8, %c0_9] : memref<1x32xf32, #tpu.memory_space<vmem>>, vector<1x32xf32>
    %c0_10 = arith.constant 0 : index
    %c0_11 = arith.constant 0 : index
    %9 = vector.load %arg6[%c0_10, %c0_11] : memref<1x32xf32, #tpu.memory_space<vmem>>, vector<1x32xf32>
    %c0_12 = arith.constant 0 : index
    %c0_13 = arith.constant 0 : index
    %10 = vector.load %arg7[%c0_12, %c0_13] : memref<1x1xf32, #tpu.memory_space<vmem>>, vector<1x1xf32>
    %11 = vector.shape_cast %5 : vector<1x32xf32> to vector<1x1x32xf32>
    %12 = vector.broadcast %1 : vector<2x8x1xf32> to vector<2x8x32xf32>
    %13 = vector.broadcast %11 : vector<1x1x32xf32> to vector<2x8x32xf32>
    %14 = arith.mulf %12, %13 : vector<2x8x32xf32>
    %15 = vector.shape_cast %6 : vector<1x32xf32> to vector<1x1x32xf32>
    %16 = vector.broadcast %15 : vector<1x1x32xf32> to vector<2x8x32xf32>
    %17 = arith.addf %14, %16 : vector<2x8x32xf32>
    %cst = arith.constant 0.000000e+00 : f32
    %18 = vector.broadcast %cst : f32 to vector<2x8x32xf32>
    %19 = arith.maximumf %17, %18 : vector<2x8x32xf32>
    "tpu.trace_start"() <{level = 10 : i32, message = "tkh,hg->tkg"}> : () -> ()
    %cst_14 = arith.constant dense<0.000000e+00> : vector<2x8x32xf32>
    %20 = tpu.matmul %19, %7, %cst_14 {dimension_numbers = #tpu.dot_dimension_numbers<[2], [0], [0, 1], [1], [0, 0, 0, 1, 1, 1], [], []>} : vector<2x8x32xf32>, vector<32x32xf32>, vector<2x8x32xf32> -> vector<2x8x32xf32>
    "tpu.trace_stop"() : () -> ()
    %21 = vector.shape_cast %8 : vector<1x32xf32> to vector<1x1x32xf32>
    %22 = vector.broadcast %21 : vector<1x1x32xf32> to vector<2x8x32xf32>
    %23 = arith.addf %20, %22 : vector<2x8x32xf32>
    %cst_15 = arith.constant 0.000000e+00 : f32
    %24 = vector.broadcast %cst_15 : f32 to vector<2x8x32xf32>
    %25 = arith.maximumf %23, %24 : vector<2x8x32xf32>
    %26 = vector.shape_cast %9 : vector<1x32xf32> to vector<1x1x32xf32>
    %27 = vector.broadcast %26 : vector<1x1x32xf32> to vector<2x8x32xf32>
    %28 = arith.mulf %25, %27 : vector<2x8x32xf32>
    %cst_16 = arith.constant dense<0.000000e+00> : vector<2x8xf32>
    %29 = vector.multi_reduction <add>, %28, %cst_16 [2] : vector<2x8x32xf32> to vector<2x8xf32>
    %30 = vector.shape_cast %29 : vector<2x8xf32> to vector<2x8x1xf32>
    %31 = vector.shape_cast %10 : vector<1x1xf32> to vector<1x1x1xf32>
    %32 = vector.broadcast %31 : vector<1x1x1xf32> to vector<2x8x1xf32>
    %33 = arith.addf %30, %32 : vector<2x8x1xf32>
    %34 = arith.subf %33, %2 : vector<2x8x1xf32>
    %cst_17 = arith.constant 2.500000e-01 : f32
    %35 = vector.broadcast %cst_17 : f32 to vector<2x8x1xf32>
    %36 = arith.mulf %35, %34 : vector<2x8x1xf32>
    %37 = vector.broadcast %36 : vector<2x8x1xf32> to vector<2x8x32xf32>
    %38 = arith.mulf %25, %37 : vector<2x8x32xf32>
    %cst_18 = arith.constant dense<0.000000e+00> : vector<2x32xf32>
    %39 = vector.multi_reduction <add>, %38, %cst_18 [1] : vector<2x8x32xf32> to vector<2x32xf32>
    %40 = vector.shape_cast %39 : vector<2x32xf32> to vector<2x1x32xf32>
    %cst_19 = arith.constant dense<0.000000e+00> : vector<2x1xf32>
    %41 = vector.multi_reduction <add>, %36, %cst_19 [1] : vector<2x8x1xf32> to vector<2x1xf32>
    %42 = vector.shape_cast %41 : vector<2x1xf32> to vector<2x1x1xf32>
    %43 = vector.shape_cast %9 : vector<1x32xf32> to vector<1x1x32xf32>
    %44 = vector.broadcast %36 : vector<2x8x1xf32> to vector<2x8x32xf32>
    %45 = vector.broadcast %43 : vector<1x1x32xf32> to vector<2x8x32xf32>
    %46 = arith.mulf %44, %45 : vector<2x8x32xf32>
    %cst_20 = arith.constant 0.000000e+00 : f32
    %47 = vector.broadcast %cst_20 : f32 to vector<2x8x32xf32>
    %48 = arith.cmpf ogt, %23, %47 : vector<2x8x32xf32>
    %cst_21 = arith.constant 0.000000e+00 : f32
    %49 = vector.broadcast %cst_21 : f32 to vector<2x8x32xf32>
    %50 = arith.select %48, %46, %49 : vector<2x8x32xi1>, vector<2x8x32xf32>
    %cst_22 = arith.constant dense<0.000000e+00> : vector<2x32xf32>
    %51 = vector.multi_reduction <add>, %50, %cst_22 [1] : vector<2x8x32xf32> to vector<2x32xf32>
    %52 = vector.shape_cast %51 : vector<2x32xf32> to vector<2x1x32xf32>
    "tpu.trace_start"() <{level = 10 : i32, message = "tkg,hg->tkh"}> : () -> ()
    %cst_23 = arith.constant dense<0.000000e+00> : vector<2x8x32xf32>
    %53 = tpu.matmul %50, %7, %cst_23 {dimension_numbers = #tpu.dot_dimension_numbers<[2], [1], [0, 1], [0], [0, 0, 0, 1, 1, 0], [], []>} : vector<2x8x32xf32>, vector<32x32xf32>, vector<2x8x32xf32> -> vector<2x8x32xf32>
    %cst_24 = arith.constant 0.000000e+00 : f32
    "tpu.trace_stop"() : () -> ()
    %54 = vector.broadcast %cst_24 : f32 to vector<2x8x32xf32>
    %55 = arith.cmpf ogt, %17, %54 : vector<2x8x32xf32>
    %cst_25 = arith.constant 0.000000e+00 : f32
    %56 = vector.broadcast %cst_25 : f32 to vector<2x8x32xf32>
    %57 = arith.select %55, %53, %56 : vector<2x8x32xi1>, vector<2x8x32xf32>
    %58 = vector.broadcast %1 : vector<2x8x1xf32> to vector<2x8x32xf32>
    %59 = arith.mulf %58, %57 : vector<2x8x32xf32>
    %cst_26 = arith.constant dense<0.000000e+00> : vector<2x32xf32>
    %60 = vector.multi_reduction <add>, %59, %cst_26 [1] : vector<2x8x32xf32> to vector<2x32xf32>
    %61 = vector.shape_cast %60 : vector<2x32xf32> to vector<2x1x32xf32>
    %cst_27 = arith.constant dense<0.000000e+00> : vector<2x32xf32>
    %62 = vector.multi_reduction <add>, %57, %cst_27 [1] : vector<2x8x32xf32> to vector<2x32xf32>
    %63 = vector.shape_cast %62 : vector<2x32xf32> to vector<2x1x32xf32>
    %64 = vector.shape_cast %5 : vector<1x32xf32> to vector<1x1x32xf32>
    %cst_28 = arith.constant 0.00999999977 : f32
    %65 = vector.broadcast %cst_28 : f32 to vector<2x1x32xf32>
    %66 = arith.mulf %65, %61 : vector<2x1x32xf32>
    %67 = vector.broadcast %64 : vector<1x1x32xf32> to vector<2x1x32xf32>
    %68 = arith.subf %67, %66 : vector<2x1x32xf32>
    %69 = vector.shape_cast %6 : vector<1x32xf32> to vector<1x1x32xf32>
    %cst_29 = arith.constant 0.00999999977 : f32
    %70 = vector.broadcast %cst_29 : f32 to vector<2x1x32xf32>
    %71 = arith.mulf %70, %63 : vector<2x1x32xf32>
    %72 = vector.broadcast %69 : vector<1x1x32xf32> to vector<2x1x32xf32>
    %73 = arith.subf %72, %71 : vector<2x1x32xf32>
    %74 = vector.shape_cast %8 : vector<1x32xf32> to vector<1x1x32xf32>
    %cst_30 = arith.constant 0.00999999977 : f32
    %75 = vector.broadcast %cst_30 : f32 to vector<2x1x32xf32>
    %76 = arith.mulf %75, %52 : vector<2x1x32xf32>
    %77 = vector.broadcast %74 : vector<1x1x32xf32> to vector<2x1x32xf32>
    %78 = arith.subf %77, %76 : vector<2x1x32xf32>
    %79 = vector.shape_cast %9 : vector<1x32xf32> to vector<1x1x32xf32>
    %cst_31 = arith.constant 0.00999999977 : f32
    %80 = vector.broadcast %cst_31 : f32 to vector<2x1x32xf32>
    %81 = arith.mulf %80, %40 : vector<2x1x32xf32>
    %82 = vector.broadcast %79 : vector<1x1x32xf32> to vector<2x1x32xf32>
    %83 = arith.subf %82, %81 : vector<2x1x32xf32>
    %84 = vector.shape_cast %10 : vector<1x1xf32> to vector<1x1x1xf32>
    %cst_32 = arith.constant 0.00999999977 : f32
    %85 = vector.broadcast %cst_32 : f32 to vector<2x1x1xf32>
    %86 = arith.mulf %85, %42 : vector<2x1x1xf32>
    %87 = vector.broadcast %84 : vector<1x1x1xf32> to vector<2x1x1xf32>
    %88 = arith.subf %87, %86 : vector<2x1x1xf32>
    %89 = vector.broadcast %3 : vector<2x8x1xf32> to vector<2x8x32xf32>
    %90 = vector.broadcast %68 : vector<2x1x32xf32> to vector<2x8x32xf32>
    %91 = arith.mulf %89, %90 : vector<2x8x32xf32>
    %92 = vector.broadcast %73 : vector<2x1x32xf32> to vector<2x8x32xf32>
    %93 = arith.addf %91, %92 : vector<2x8x32xf32>
    %cst_33 = arith.constant 0.000000e+00 : f32
    %94 = vector.broadcast %cst_33 : f32 to vector<2x8x32xf32>
    %95 = arith.maximumf %93, %94 : vector<2x8x32xf32>
    "tpu.trace_start"() <{level = 10 : i32, message = "tqh,hg->tqg"}> : () -> ()
    %cst_34 = arith.constant dense<0.000000e+00> : vector<2x8x32xf32>
    %96 = tpu.matmul %95, %7, %cst_34 {dimension_numbers = #tpu.dot_dimension_numbers<[2], [0], [0, 1], [1], [0, 0, 0, 1, 1, 1], [], []>} : vector<2x8x32xf32>, vector<32x32xf32>, vector<2x8x32xf32> -> vector<2x8x32xf32>
    "tpu.trace_stop"() : () -> ()
    "tpu.trace_start"() <{level = 10 : i32, message = "tqh,tkh->tqk"}> : () -> ()
    %cst_35 = arith.constant dense<0.000000e+00> : vector<2x8x8xf32>
    %97 = tpu.matmul %95, %19, %cst_35 {dimension_numbers = #tpu.dot_dimension_numbers<[2], [2], [1], [1], [0, 0, 0, 1, 1, 1], [0], [0]>} : vector<2x8x32xf32>, vector<2x8x32xf32>, vector<2x8x8xf32> -> vector<2x8x8xf32>
    "tpu.trace_stop"() : () -> ()
    "tpu.trace_start"() <{level = 10 : i32, message = "tqk,tkg->tqg"}> : () -> ()
    %cst_36 = arith.constant dense<0.000000e+00> : vector<2x8x32xf32>
    %98 = tpu.matmul %97, %50, %cst_36 {dimension_numbers = #tpu.dot_dimension_numbers<[2], [1], [1], [2], [0, 0, 0, 1, 1, 2], [0], [0]>} : vector<2x8x8xf32>, vector<2x8x32xf32>, vector<2x8x32xf32> -> vector<2x8x32xf32>
    "tpu.trace_stop"() : () -> ()
    %cst_37 = arith.constant 0.00999999977 : f32
    %99 = vector.broadcast %cst_37 : f32 to vector<2x8x32xf32>
    %100 = arith.mulf %99, %98 : vector<2x8x32xf32>
    %101 = arith.subf %96, %100 : vector<2x8x32xf32>
    %102 = vector.broadcast %78 : vector<2x1x32xf32> to vector<2x8x32xf32>
    %103 = arith.addf %101, %102 : vector<2x8x32xf32>
    %cst_38 = arith.constant 0.000000e+00 : f32
    %104 = vector.broadcast %cst_38 : f32 to vector<2x8x32xf32>
    %105 = arith.maximumf %103, %104 : vector<2x8x32xf32>
    %106 = vector.broadcast %83 : vector<2x1x32xf32> to vector<2x8x32xf32>
    %107 = arith.mulf %105, %106 : vector<2x8x32xf32>
    %cst_39 = arith.constant dense<0.000000e+00> : vector<2x8xf32>
    %108 = vector.multi_reduction <add>, %107, %cst_39 [2] : vector<2x8x32xf32> to vector<2x8xf32>
    %109 = vector.shape_cast %108 : vector<2x8xf32> to vector<2x8x1xf32>
    %110 = vector.broadcast %88 : vector<2x1x1xf32> to vector<2x8x1xf32>
    %111 = arith.addf %109, %110 : vector<2x8x1xf32>
    %112 = arith.subf %111, %4 : vector<2x8x1xf32>
    %113 = arith.mulf %112, %112 : vector<2x8x1xf32>
    %cst_40 = arith.constant dense<0.000000e+00> : vector<2x1xf32>
    %114 = vector.multi_reduction <add>, %113, %cst_40 [1] : vector<2x8x1xf32> to vector<2x1xf32>
    %115 = vector.shape_cast %114 : vector<2x1xf32> to vector<2x1x1xf32>
    %cst_41 = arith.constant 1.250000e-01 : f32
    %116 = vector.broadcast %cst_41 : f32 to vector<2x1x1xf32>
    %117 = arith.mulf %115, %116 : vector<2x1x1xf32>
    %c2_i32 = arith.constant 2 : i32
    %118 = arith.muli %arg0, %c2_i32 : i32
    %119 = tpu.iota {dimensions = array<i32: 0>} : vector<2x1x1xi32>
    %120 = vector.broadcast %118 : i32 to vector<2x1x1xi32>
    %121 = arith.addi %119, %120 : vector<2x1x1xi32>
    %c4_i32 = arith.constant 4 : i32
    %122 = vector.broadcast %c4_i32 : i32 to vector<2x1x1xi32>
    %123 = arith.cmpi slt, %121, %122 : vector<2x1x1xi32>
    %cst_42 = arith.constant 0.000000e+00 : f32
    %124 = vector.broadcast %cst_42 : f32 to vector<2x1x1xf32>
    %125 = arith.select %123, %117, %124 : vector<2x1x1xi1>, vector<2x1x1xf32>
    %cst_43 = arith.constant dense<0.000000e+00> : vector<1x1xf32>
    %126 = vector.multi_reduction <add>, %125, %cst_43 [0] : vector<2x1x1xf32> to vector<1x1xf32>
    %127 = vector.shape_cast %126 : vector<1x1xf32> to vector<1x1x1xf32>
    %128 = vector.shape_cast %127 : vector<1x1x1xf32> to vector<1x1x1xf32>
    %129 = vector.broadcast %128 : vector<1x1x1xf32> to vector<1x1x128xf32>
    %c0_44 = arith.constant 0 : index
    %c0_45 = arith.constant 0 : index
    %c0_46 = arith.constant 0 : index
    %130 = vector.load %arg8[%c0_44, %c0_45, %c0_46] : memref<1x1x128xf32, #tpu.memory_space<vmem>>, vector<1x1x128xf32>
    tpu.vector_store %arg8[%c0_44, %c0_45, %c0_46], %129 {strides = array<i32>} : memref<1x1x128xf32, #tpu.memory_space<vmem>>, vector<1x1x128xf32>,
    return
  }
  func.func @transform_0(%arg0: i32) -> (i32, i32, i32) {
    %c0_i32 = arith.constant 0 : i32
    %c0_i32_0 = arith.constant 0 : i32
    %c0_i32_1 = arith.constant 0 : i32
    return %arg0, %c0_i32, %c0_i32_0 : i32, i32, i32
  }
  func.func @transform_1(%arg0: i32) -> (i32, i32) {
    %c0_i32 = arith.constant 0 : i32
    %c0_i32_0 = arith.constant 0 : i32
    %c0_i32_1 = arith.constant 0 : i32
    return %c0_i32, %c0_i32_0 : i32, i32
  }
  func.func @transform_2(%arg0: i32) -> (i32, i32) {
    %c0_i32 = arith.constant 0 : i32
    %c0_i32_0 = arith.constant 0 : i32
    %c0_i32_1 = arith.constant 0 : i32
    return %c0_i32, %c0_i32_0 : i32, i32
  }
  func.func @transform_3(%arg0: i32) -> (i32, i32) {
    %c0_i32 = arith.constant 0 : i32
    %c0_i32_0 = arith.constant 0 : i32
    %c0_i32_1 = arith.constant 0 : i32
    return %c0_i32, %c0_i32_0 : i32, i32
  }
  func.func @transform_4(%arg0: i32) -> (i32, i32) {
    %c0_i32 = arith.constant 0 : i32
    %c0_i32_0 = arith.constant 0 : i32
    %c0_i32_1 = arith.constant 0 : i32
    return %c0_i32, %c0_i32_0 : i32, i32
  }
  func.func @transform_5(%arg0: i32) -> (i32, i32) {
    %c0_i32 = arith.constant 0 : i32
    %c0_i32_0 = arith.constant 0 : i32
    %c0_i32_1 = arith.constant 0 : i32
    return %c0_i32, %c0_i32_0 : i32, i32
  }
  func.func @transform_6(%arg0: i32) -> (i32, i32) {
    %c0_i32 = arith.constant 0 : i32
    %c0_i32_0 = arith.constant 0 : i32
    %c0_i32_1 = arith.constant 0 : i32
    return %c0_i32, %c0_i32_0 : i32, i32
  }
  func.func @transform_7(%arg0: i32) -> (i32, i32, i32) {
    %c0_i32 = arith.constant 0 : i32
    %c0_i32_0 = arith.constant 0 : i32
    %c0_i32_1 = arith.constant 0 : i32
    return %arg0, %c0_i32, %c0_i32_0 : i32, i32, i32
  }
}

</mosaic_0001>

<bundles_post_ra>
// kernel: tpu_custom_call.1
= control target key start
LH: loop header
LB: loop body
LE: loop exit
PB: predicated region body
PF: predicated region fallthrough
CT: control target
= control target key end

     0   :  { %s1235_s0 = inlined_call_operand.vmem [shape: f32[4,8,4], index: 0, kind: input, shape index: {}]   ;;  %s1236_s1 = inlined_call_operand.vmem [shape: f32[1,32], index: 1, kind: input, shape index: {}]   ;;  %s1237_s2 = inlined_call_operand.vmem [shape: f32[1,32], index: 2, kind: input, shape index: {}]   ;;  %s1238_s3 = inlined_call_operand.vmem [shape: f32[32,32], index: 3, kind: input, shape index: {}]   ;;  %s1239_s4 = inlined_call_operand.vmem [shape: f32[1,32], index: 4, kind: input, shape index: {}]   ;;  %s1240_s5 = inlined_call_operand.vmem [shape: f32[1,32], index: 5, kind: input, shape index: {}]   ;;  %s1241_s6 = inlined_call_operand.<no memory space> [shape: f32[1,1], index: 6, kind: input, shape index: {}]   ;;  %s1242_s7 = inlined_call_operand.hbm [shape: f32[2,1,128], index: 7, kind: output, shape index: {}]  }
   0x1   :  { %v12_v0 = vstv %s1241_s6 }
   0x2   :  { %13 = vst [vmem:[#allocation2] sm:$0x1] %v12_v0 }
   0x3   :  { %14 = vsyncpa [#allocation4], 0 }
   0x4   :  { %16 = vsyncpa [#allocation4 + $0x1], 0  ;;  %s1008_s26 = smov 0   ;;  %s1010_s27 = smov 0  }
   0x5   :  { %s1012_s28 = smov 0   ;;  %s1014_s29 = smov 0  }
   0x6 LB: > { %s1029_s6 = sadd.s32 4294967295, %s959_s29   ;;  %s818_s30 = sadd.s32 4294967294, %s959_s29   ;;  %s959_s29 = sphi %s1014_s29, %s1248_s29   ;;  %s955_s28 = sphi %s1012_s28, %s1247_s28   ;;  %s951_s27 = sphi %s1010_s27, %s1246_s27   ;;  %s947_s26 = sphi %s1008_s26, %s1245_s26  }
   0x7   : > { %s1033_s8 = sadd.s32 1, %s959_s29   ;;  %s181_s9 = sadd.s32 1, %s955_s28 }
   0x8   : > { %s178_s10 = ssub.s32 %s959_s29, %s1033_s8  ;;  %p191_p0 = scmp.ne.s32.totalorder %s955_s28, %s951_s27 }
   0x9   : > { %p179_p1 = scmp.eq.s32.totalorder %s178_s10, 0  ;;  %p192_p2 = scmp.eq.s32.totalorder %s1029_s6, 1 }
   0xa   : > { %p197_p3 = scmp.ne.s32.totalorder %s951_s27, %s947_s26  ;;  %p198_p4 = scmp.eq.s32.totalorder %s818_s30, 1 }
   0xb   : > { %s1044_s11 = scalar_select %p179_p1, %s955_s28, %s181_s9  }
   0xc   : > { %p1046_p5 = por %p192_p2, %p191_p0  ;;  %p1050_p6 = por %p198_p4, %p197_p3 }
   0xd   : > { %p821_p7 = scmp.ge.s32.totalorder %s959_s29, 1  ;;  %p243_p8 = scmp.lt.s32.totalorder %s959_s29, 3 }
   0xf   : > { %p244_p9 = pnand %p821_p7, %p243_p8 }
  0x10   : > { %s1057_s14 = sshll.u32 (!%p244_p9), %s1029_s6, 1  ;;  %s962_s22 = smov (!%p244_p9), 127  }
  0x11   : > { %247 = sbr.rel (%p244_p9) target bundleno = 1233 (0x4d1), region = 48  ;;  %p275_p10 = scmp.lt.s32.totalorder (!%p244_p9), %s1057_s14, 3 }
  0x12   : > { %s964_s9 = smov (!%p244_p9), 125   ;;  %s759_s20 = scalar_lea.hbm (!%p244_p9), %s1242_s7, %s1029_s6 }
  0x13   : > { %s763_s23 = sshll.u32 (!%p244_p9), %s759_s20, 4  ;;  %s917_s15 = scalar_lea.hbm (!%p244_p9), %s1242_s7, 2  ;;  %s764_s23 = int_to_ptr.hbm [resolvable:$true] %s763_s23 }
  0x14   : > { %s911_s25 = sshra.s32 (!%p244_p9), %s764_s23, 4  ;;  %s912_s25 = int_to_ptr.hbm [resolvable:$true] %s911_s25 }
  0x15   : > { %s913_s30 = scalar_lea.hbm (!%p244_p9), %s912_s25, 1  ;;  %p918_p0 = scmp.lt.s32.totalorder (!%p244_p9), %s912_s25, %s1242_s7 }
  0x16   : > { %v287_v1 = vld [vmem:[%s1238_s3 + $0x18] sm:$0xff]  ;;  %v961_v2 = vmov 0   ;;  %s276_s17 = scalar_select %p275_p10, %s1057_s14, 3  ;;  %v286_v5 = vld [vmem:[%s1238_s3 + $0x10] sm:$0xff]  ;;  %v285_v6 = vld [vmem:[%s1238_s3 + $0x8] sm:$0xff]  ;;  %vm316_vm0 = vcmask 261120  }
  0x17   : > { %888 = vset.pattern.permute.xlu0 %v961_v2  ;;  %335 = vmatpush.msra.mxu0 %v287_v1  ;;  %v284_v7 = vld [vmem:[%s1238_s3] sm:$0xff]  ;;  %v963_v41 = vmov 2   ;;  %vm625_vm5 = vcmask 64512   ;;  %vm400_vm6 = vcmask 7168   ;;  %p914_p11 = scmp.ne.s32.totalorder %s912_s25, %s913_s30  ;;  %p919_p1 = scmp.lt.s32.totalorder %s917_s15, %s913_s30 }
  0x18   : > { %574 = vmatpush.msra.mxu2 %v287_v1  ;;  %s823_s18 = sshll.u32 %s276_s17, 3  ;;  %826 = vmatpush.xpose.msk.msra.mxu1 %vm316_vm0, %v287_v1  ;;  %v892_v8 = vld [vmem:[%s1236_s1] ss:$0 sm:$0xff] }
  0x19   : > { %s278_s21 = scalar_lea.vmem %s1235_s0, %s823_s18  ;;  %336 = vmatpush.msra.mxu0 %v286_v5  ;;  %v893_v9 = vld [vmem:[%s1237_s2] ss:$0 sm:$0xff]  ;;  %890 = vset.pattern.permute.xlu2 %v963_v41  ;;  %p915_p12 = pnand %p914_p11, %p1046_p5 }
  0x1a   : > { %v1068_v3 = vld [vmem:[%s278_s21] sm:$0xff]  ;;  %v1071_v4 = vld [vmem:[%s278_s21 + $0x8] sm:$0xff]  ;;  %575 = vmatpush.msra.mxu2 %v286_v5  ;;  %p920_p2 = por %p919_p1, %p918_p0 }
  0x1b   : > { %293 = vperm.xlu0 %888, %v1068_v3   ;;  %337 = vmatpush.msra.mxu0 %v285_v6  ;;  %v894_v18 = vld [vmem:[%s1239_s4] ss:$0 sm:$0xff]  ;;  %p916_p13 = pneg %p915_p12 }
  0x1c   : > { %576 = vmatpush.msra.mxu2 %v285_v6  ;;  %827 = vmatpush.xpose.msk.msra.mxu1 %vm316_vm0, %v286_v5  ;;  %v895_v21 = vld [vmem:[%s1240_s5] ss:$0 sm:$0xff] }
  0x1d   : > { %338 = vmatpush.msra.mxu0 %v284_v7  ;;  %v896_v32 = vld [vmem:[#allocation2] ss:$0 sm:$0xff]  ;;  %p921_p3 = pnand %p920_p2, %p916_p13 }
  0x1e   : > { %577 = vmatpush.msra.mxu2 %v284_v7 }
  0x20   : > { %828 = vmatpush.xpose.msk.msra.mxu1 %vm316_vm0, %v285_v6 }
  0x23   : > { %298 = vperm.xlu0 %888, %v1071_v4  }
  0x24   : > { %829 = vmatpush.xpose.msk.msra.mxu1 %vm316_vm0, %v284_v7 }
  0x8d   : > { %v294_v10 = vpop.permute.xlu0 %293 }
  0x8e   : > { %v304_v11 = vmul.f32 %v892_v8, %v294_v10 }
  0x90   : > { %v309_v12 = vadd.f32 %v893_v9, %v304_v11 }
  0x92   : > { %v311_v13 = vmax.f32 %v309_v12, 0.0  ;;  %vm476_vm3 = vcmp.gt.f32.partialorder %v309_v12, 0.0 }
  0x94   : > { %824 = vmatmul.msk.f32.vlgmr.msra.gmra.mxu0 %vm316_vm0, %v311_v13  ;;  %834 = vmatpush.xpose.msk.msra.mxu3 %vm316_vm0, %v311_v13 }
  0x95   : > { %v1095_v14 = vpop.permute.xlu0 %298 }
  0x96   : > { %v305_v15 = vmul.f32 %v892_v8, %v1095_v14 }
  0x98   : > { %v1098_v16 = vadd.f32 %v893_v9, %v305_v15  ;;  %v282_v15 = vld [vmem:[%s1236_s1] sm:$0x1] }
  0x9a   : > { %v312_v17 = vmax.f32 %v1098_v16, 0.0  ;;  %vm477_vm4 = vcmp.gt.f32.partialorder %v1098_v16, 0.0 }
  0x9c   : > { %825 = vmatmul.msk.f32.gmra.mxu0 %vm316_vm0, %v312_v17  ;;  %836 = vmatpush.xpose.msk.msrb.mxu3 %vm316_vm0, %v312_v17 }
 0x111   : > { %v340_v19 = vpop.f32.mrf.mxu0 }
 0x112   : > { %v1106_v20 = vadd.f32 %v894_v18, %v340_v19 }
 0x114   : > { %v346_v22 = vmax.f32 %v1106_v20, 0.0  ;;  %vm417_vm1 = vcmp.gt.f32.partialorder %v1106_v20, 0.0 }
 0x116   : > { %v351_v23 = vmul.f32 %v895_v21, %v346_v22 }
 0x118   : > { %v353_v24 = vsel %vm316_vm0, %v351_v23, 0.0 }
 0x119   : > { %354 = vadd.xlane.f32.xlu1 %v353_v24  ;;  %v343_v25 = vpop.f32.mrf.mxu0 }
 0x11a   : > { %v1115_v26 = vadd.f32 %v894_v18, %v343_v25 }
 0x11c   : > { %v347_v27 = vmax.f32 %v1115_v26, 0.0  ;;  %vm418_vm2 = vcmp.gt.f32.partialorder %v1115_v26, 0.0 }
 0x11e   : > { %v352_v28 = vmul.f32 %v895_v21, %v347_v27 }
 0x120   : > { %v356_v29 = vsel %vm316_vm0, %v352_v28, 0.0 }
 0x121   : > { %357 = vadd.xlane.f32.xlu2 %v356_v29 }
 0x132   : > { %364 = vrot.lane.b32.xlu1 %v1068_v3, %s962_s22 }
 0x139   : > { %366 = vrot.lane.b32.xlu2 %v1071_v4, %s962_s22 }
 0x141   : > { %535 = vperm.xlu2 %890, %v1071_v4  }
 0x18c   : > { %v355_v30 = vpop.xlane.xlu1 %354 }
 0x18d   : > { %v362_v33 = vadd.f32 %v896_v32, %v355_v30 }
 0x194   : > { %v358_v31 = vpop.xlane.xlu2 %357 }
 0x195   : > { %v363_v38 = vadd.f32 %v896_v32, %v358_v31 }
 0x19c   : > { %v367_v37 = vpop.permute.xlu2 %366 }
 0x19d   : > { %v371_v39 = vsub.f32 %v363_v38, %v367_v37 }
 0x19f   : > { %v1126_v40 = vmul.f32 0.25, %v371_v39 }
 0x1a4   : > { %v365_v34 = vpop.permute.xlu1 %364 }
 0x1a5   : > { %v370_v35 = vsub.f32 %v362_v33, %v365_v34 }
 0x1a7   : > { %v1123_v36 = vmul.f32 0.25, %v370_v35 }
 0x1a9   : > { %376 = vperm.xlu0 %888, %v1123_v36  }
 0x1b1   : > { %381 = vperm.xlu0 %888, %v1126_v40  }
 0x1b9   : > { %889 = vset.pattern.permute.xlu0 %v963_v41 }
 0x1ba   : > { %531 = vperm.xlu0 %889, %v1068_v3  }
 0x1c2   : > { %891 = vset.pattern.permute.xlu0 %v961_v2 }
 0x1c3   : > { %708 = vrot.lane.b32.xlu0 %v1068_v3, %s964_s9 }
 0x1cb   : > { %710 = vrot.lane.b32.xlu0 %v1071_v4, %s964_s9 }
 0x21b   : > { %v1131_v42 = vpop.permute.xlu0 %376 }
 0x21c   : > { %v1134_v43 = vmul.f32 %v895_v21, %v1131_v42 }
 0x21e   : > { %v1141_v44 = vsel %vm417_vm1, %v1134_v43, 0.0 }
 0x21f   : > { %830 = vmatmul.msk.f32.vlgmr.msra.gmra.mxu1 %vm316_vm0, %v1141_v44 }
 0x223   : > { %v1145_v45 = vpop.permute.xlu0 %381 }
 0x224   : > { %v416_v46 = vmul.f32 %v895_v21, %v1145_v45 }
 0x226   : > { %840 = vmatpush.msk.msrb.mxu0 %vm418_vm2, %v416_v46  ;;  %v1149_v47 = vsel %vm418_vm2, %v416_v46, 0.0  ;;  %v536_v46 = vpop.permute.xlu2 %535 }
 0x227   : > { %831 = vmatmul.msk.f32.gmra.mxu1 %vm316_vm0, %v1149_v47 }
 0x22c   : > { %v532_v25 = vpop.permute.xlu0 %531 }
 0x29c   : > { %v470_v48 = vpop.f32.mrf.mxu1 }
 0x29d   : > { %v478_v49 = vsel %vm476_vm3, %v470_v48, 0.0 }
 0x29e   : > { %v480_v50 = vmul.f32 %v478_v49, %v294_v10  ;;  %v496_v51 = vsel %vm316_vm0, %v478_v49, 0.0 }
 0x29f   : > { %v497_v52 = vrot.slane %v496_v51, 4 }
 0x2a0   : > { %v482_v53 = vsel %vm316_vm0, %v480_v50, 0.0 }
 0x2a1   : > { %v483_v54 = vrot.slane %v482_v53, 4  ;;  %v498_v55 = vadd.f32 %v497_v52, %v496_v51 }
 0x2a3   : > { %v484_v56 = vadd.f32 %v483_v54, %v482_v53  ;;  %v499_v57 = vrot.slane %v498_v55, 2 }
 0x2a4   : > { %v473_v58 = vpop.f32.mrf.mxu1 }
 0x2a5   : > { %v485_v59 = vrot.slane %v484_v56, 2  ;;  %v500_v60 = vadd.f32 %v499_v57, %v498_v55  ;;  %v479_v61 = vsel %vm477_vm4, %v473_v58, 0.0  ;;  %v421_v55 = vsel %vm316_vm0, %v1141_v44, 0.0 }
 0x2a6   : > { %v481_v62 = vmul.f32 %v479_v61, %v1095_v14  ;;  %v503_v63 = vsel %vm316_vm0, %v479_v61, 0.0  ;;  %v283_v14 = vld [vmem:[%s1237_s2] sm:$0x1]  ;;  %v428_v57 = vsel %vm316_vm0, %v1149_v47, 0.0  ;;  %v422_v58 = vrot.slane %v421_v55, 4 }
 0x2a7   : > { %v486_v0 = vadd.f32 %v485_v59, %v484_v56  ;;  %v501_v1 = vrot.slane %v500_v60, 1  ;;  %v504_v2 = vrot.slane %v503_v63, 4  ;;  %v385_v56 = vmul.f32 %v1145_v45, %v347_v27 }
 0x2a8   : > { %v489_v5 = vsel %vm316_vm0, %v481_v62, 0.0  ;;  %v429_v3 = vrot.slane %v428_v57, 4  ;;  %v423_v20 = vadd.f32 %v422_v58, %v421_v55 }
 0x2a9   : > { %v502_v6 = vadd.f32 %v501_v1, %v500_v60  ;;  %v490_v7 = vrot.slane %v489_v5, 4  ;;  %v505_v8 = vadd.f32 %v504_v2, %v503_v63  ;;  %v487_v9 = vrot.slane %v486_v0, 1 }
 0x2aa   : > { %v393_v4 = vsel %vm316_vm0, %v385_v56, 0.0  ;;  %v424_v62 = vrot.slane %v423_v20, 2 }
 0x2ab   : > { %v491_v10 = vadd.f32 %v490_v7, %v489_v5  ;;  %v506_v11 = vrot.slane %v505_v8, 2  ;;  %v488_v12 = vadd.f32 %v487_v9, %v486_v0  ;;  %v514_v13 = vmul.f32 0.01, %v502_v6 }
 0x2ac   : > { %v394_v61 = vrot.slane %v393_v4, 4  ;;  %v425_v0 = vadd.f32 %v424_v62, %v423_v20  ;;  %v709_v62 = vpop.permute.xlu0 %708 }
 0x2ad   : > { %v492_v16 = vrot.slane %v491_v10, 2  ;;  %v507_v17 = vadd.f32 %v506_v11, %v505_v8  ;;  %v510_v18 = vmul.f32 0.01, %v488_v12  ;;  %v516_v24 = vsub.f32 %v283_v14, %v514_v13  ;;  %v288_v13 = vld [vmem:[%s1239_s4] sm:$0x1] }
 0x2ae   : > { %v395_v44 = vadd.f32 %v394_v61, %v393_v4  ;;  %v426_v47 = vrot.slane %v425_v0, 1 }
 0x2af   : > { %v493_v19 = vadd.f32 %v492_v16, %v491_v10  ;;  %v508_v21 = vrot.slane %v507_v17, 1  ;;  %v512_v23 = vsub.f32 %v282_v15, %v510_v18  ;;  %v548_v31 = vperm.slane %v516_v24, 0  ;;  %v289_v18 = vld [vmem:[%s1240_s5] sm:$0x1] }
 0x2b0   : > { %v396_v27 = vrot.slane %v395_v44, 2  ;;  %v427_v7 = vadd.f32 %v426_v47, %v425_v0 }
 0x2b1   : > { %v509_v28 = vadd.f32 %v508_v21, %v507_v17  ;;  %v540_v29 = vperm.slane %v512_v23, 0  ;;  %v494_v30 = vrot.slane %v493_v19, 1 }
 0x2b2   : > { %v397_v2 = vadd.f32 %v396_v27, %v395_v44  ;;  %v518_v11 = vmul.f32 0.01, %v427_v7 }
 0x2b3   : > { %v544_v32 = vmul.f32 %v540_v29, %v532_v25  ;;  %v495_v33 = vadd.f32 %v494_v30, %v493_v19  ;;  %v515_v34 = vmul.f32 0.01, %v509_v28 }
 0x2b4   : > { %v398_v8 = vrot.slane %v397_v2, 1  ;;  %v520_v16 = vsub.f32 %v288_v13, %v518_v11  ;;  %v711_v47 = vpop.permute.xlu0 %710 }
 0x2b5   : > { %v552_v35 = vadd.f32 %v548_v31, %v544_v32  ;;  %v511_v37 = vmul.f32 0.01, %v495_v33  ;;  %v517_v41 = vsub.f32 %v283_v14, %v515_v34 }
 0x2b6   : > { %v399_v14 = vadd.f32 %v398_v8, %v397_v2  ;;  %v678_v29 = vperm.slane %v520_v16, 0 }
 0x2b7   : > { %v554_v38 = vmax.f32 %v552_v35, 0.0  ;;  %v513_v39 = vsub.f32 %v282_v15, %v511_v37  ;;  %v549_v50 = vperm.slane %v517_v41, 0 }
 0x2b8   : > { %v523_v24 = vmul.f32 0.01, %v399_v14 }
 0x2b9   : > { %832 = vmatmul.msk.f32.vlgmr.msra.gmra.mxu2 %vm316_vm0, %v554_v38  ;;  %835 = vmatmul.msk.f32.vlgmr.msra.gmra.mxu3 %vm316_vm0, %v554_v38  ;;  %v541_v48 = vperm.slane %v513_v39, 0 }
 0x2ba   : > { %838 = vmatpush.msk.msra.mxu3 %vm417_vm1, %v1134_v43  ;;  %v384_v43 = vmul.f32 %v1131_v42, %v346_v22  ;;  %v430_v22 = vadd.f32 %v429_v3, %v428_v57  ;;  %v525_v37 = vsub.f32 %v289_v18, %v523_v24 }
 0x2bb   : > { %v545_v49 = vmul.f32 %v541_v48, %v536_v46 }
 0x2bc   : > { %v386_v59 = vsel %vm316_vm0, %v384_v43, 0.0  ;;  %v431_v63 = vrot.slane %v430_v22, 2 }
 0x2bd   : > { %v553_v51 = vadd.f32 %v549_v50, %v545_v49  ;;  %v387_v60 = vrot.slane %v386_v59, 4  ;;  %v689_v49 = vperm.slane %v525_v37, 0 }
 0x2be   : > { %v432_v45 = vadd.f32 %v431_v63, %v430_v22  ;;  %v290_v63 = vld [vmem:[#allocation2] sm:$0x1] }
 0x2bf   : > { %v555_v52 = vmax.f32 %v553_v51, 0.0  ;;  %v388_v42 = vadd.f32 %v387_v60, %v386_v59 }
 0x2c0   : > { %v433_v5 = vrot.slane %v432_v45, 1 }
 0x2c1   : > { %833 = vmatmul.msk.f32.gmra.mxu2 %vm316_vm0, %v555_v52  ;;  %837 = vmatmul.msk.f32.vlgmr.msrb.gmra.mxu3 %vm316_vm0, %v555_v52  ;;  %v389_v26 = vrot.slane %v388_v42, 2 }
 0x2c2   : > { %v434_v9 = vadd.f32 %v433_v5, %v432_v45 }
 0x2c3   : > { %v390_v1 = vadd.f32 %v389_v26, %v388_v42 }
 0x2c4   : > { %v519_v15 = vmul.f32 0.01, %v434_v9 }
 0x2c5   : > { %v391_v6 = vrot.slane %v390_v1, 1 }
 0x2c6   : > { %v521_v23 = vsub.f32 %v288_v13, %v519_v15 }
 0x2c7   : > { %v392_v12 = vadd.f32 %v391_v6, %v390_v1 }
 0x2c8   : > { %v679_v35 = vperm.slane %v521_v23, 0 }
 0x2c9   : > { %v522_v17 = vmul.f32 0.01, %v392_v12 }
 0x2cb   : > { %v524_v31 = vsub.f32 %v289_v18, %v522_v17  ;;  %v735_v18 = vstv %s1057_s14  ;;  %s272_s14 = sand.u32 1, %s951_s27  }
 0x2cc   : > { %v736_v23 = vadd.s32 1, %v735_v18  ;;  %vm737_vm7 = vcmp.lt.s32.totalorder %v735_v18, 4  ;;  %s273_s21 = scalar_lea.vmem [#allocation3], %s272_s14  ;;  %s751_s24 = scalar_lea.sflag [#allocation4], %s272_s14 }
 0x2cd   : > { %v688_v41 = vperm.slane %v524_v31, 0  ;;  %s761_s22 = sshll.u32 %s273_s21, 4  ;;  %s762_s22 = int_to_ptr.vmem [resolvable:$true] %s761_s22 }
 0x2ce   : > { %vm738_vm8 = vcmp.lt.s32.totalorder %v736_v23, 4 }
 0x33c   : > { %v602_v53 = vpop.f32.mrf.mxu3  ;;  %v579_v10 = vpop.f32.mrf.mxu2 }
 0x33d   : > { %839 = vmatmul.msk.f32.vlgmr.msra.gmra.mxu3 %vm625_vm5, %v602_v53  ;;  %v401_v53 = vsel %vm400_vm6, %v1123_v36, 0.0 }
 0x33e   : > { %v402_v43 = vrot.slane %v401_v53, 4 }
 0x340   : > { %v403_v56 = vadd.f32 %v402_v43, %v401_v53 }
 0x342   : > { %v404_v58 = vrot.slane %v403_v56, 2 }
 0x344   : > { %v622_v54 = vpop.f32.mrf.mxu3  ;;  %v582_v32 = vpop.f32.mrf.mxu2  ;;  %v405_v3 = vadd.f32 %v404_v58, %v403_v56 }
 0x345   : > { %841 = vmatmul.msk.f32.vlgmr.msrb.gmra.mxu0 %vm625_vm5, %v622_v54  ;;  %v408_v54 = vsel %vm400_vm6, %v1126_v40, 0.0 }
 0x346   : > { %v409_v55 = vrot.slane %v408_v54, 4  ;;  %v406_v60 = vrot.slane %v405_v3, 1 }
 0x348   : > { %v410_v57 = vadd.f32 %v409_v55, %v408_v54  ;;  %v407_v61 = vadd.f32 %v406_v60, %v405_v3 }
 0x34a   : > { %v411_v59 = vrot.slane %v410_v57, 2  ;;  %v526_v42 = vmul.f32 0.01, %v407_v61 }
 0x34c   : > { %v412_v4 = vadd.f32 %v411_v59, %v410_v57  ;;  %v528_v36 = vsub.f32 %v290_v63, %v526_v42 }
 0x34e   : > { %v413_v20 = vrot.slane %v412_v4, 1  ;;  %v702_v0 = vperm.slane %v528_v36, 0 }
 0x350   : > { %v414_v22 = vadd.f32 %v413_v20, %v412_v4 }
 0x352   : > { %v527_v44 = vmul.f32 0.01, %v414_v22 }
 0x354   : > { %v529_v26 = vsub.f32 %v290_v63, %v527_v44 }
 0x356   : > { %v703_v45 = vperm.slane %v529_v26, 0 }
 0x3c0   : > { %v646_v19 = vpop.f32.mrf.mxu3 }
 0x3c1   : > { %v672_v21 = vmul.f32 0.01, %v646_v19 }
 0x3c2   : > { %v669_v25 = vpop.f32.mrf.mxu0 }
 0x3c3   : > { %v674_v28 = vsub.f32 %v579_v10, %v672_v21  ;;  %v673_v30 = vmul.f32 0.01, %v669_v25 }
 0x3c5   : > { %v682_v33 = vadd.f32 %v678_v29, %v674_v28  ;;  %v675_v34 = vsub.f32 %v582_v32, %v673_v30 }
 0x3c7   : > { %v684_v38 = vmax.f32 %v682_v33, 0.0  ;;  %v683_v39 = vadd.f32 %v679_v35, %v675_v34 }
 0x3c9   : > { %v685_v46 = vmax.f32 %v683_v39, 0.0  ;;  %v692_v48 = vmul.f32 %v688_v41, %v684_v38 }
 0x3cb   : > { %v694_v50 = vsel %vm316_vm0, %v692_v48, 0.0  ;;  %v693_v51 = vmul.f32 %v689_v49, %v685_v46 }
 0x3cc   : > { %695 = vadd.xlane.f32.xlu1 %v694_v50 }
 0x3cd   : > { %v697_v52 = vsel %vm316_vm0, %v693_v51, 0.0 }
 0x3ce   : > { %698 = vadd.xlane.f32.xlu2 %v697_v52 }
 0x43f   : > { %v696_v40 = vpop.xlane.xlu1 %695 }
 0x440   : > { %v706_v27 = vadd.f32 %v702_v0, %v696_v40 }
 0x441   : > { %v699_v1 = vpop.xlane.xlu2 %698 }
 0x442   : > { %v714_v2 = vsub.f32 %v706_v27, %v709_v62  ;;  %v707_v5 = vadd.f32 %v703_v45, %v699_v1 }
 0x444   : > { %v716_v6 = vmul.f32 %v714_v2, %v714_v2  ;;  %v715_v7 = vsub.f32 %v707_v5, %v711_v47 }
 0x446   : > { %v718_v8 = vsel %vm400_vm6, %v716_v6, 0.0  ;;  %v717_v9 = vmul.f32 %v715_v7, %v715_v7 }
 0x447   : > { %v719_v10 = vrot.slane %v718_v8, 4 }
 0x448   : > { %v725_v11 = vsel %vm400_vm6, %v717_v9, 0.0 }
 0x449   : > { %v720_v12 = vadd.f32 %v719_v10, %v718_v8  ;;  %v726_v13 = vrot.slane %v725_v11, 4 }
 0x44b   : > { %v721_v15 = vrot.slane %v720_v12, 2  ;;  %v727_v14 = vadd.f32 %v726_v13, %v725_v11 }
 0x44d   : > { %v722_v16 = vadd.f32 %v721_v15, %v720_v12  ;;  %v728_v17 = vrot.slane %v727_v14, 2 }
 0x44f   : > { %v723_v19 = vrot.slane %v722_v16, 1  ;;  %v729_v21 = vadd.f32 %v728_v17, %v727_v14 }
 0x451   : > { %v730_v24 = vrot.slane %v729_v21, 1  ;;  %v724_v25 = vadd.f32 %v723_v19, %v722_v16 }
 0x453   : > { %v731_v28 = vadd.f32 %v730_v24, %v729_v21  ;;  %v732_v29 = vmul.f32 0.125, %v724_v25 }
 0x455   : > { %v733_v30 = vmul.f32 0.125, %v731_v28  ;;  %v739_v31 = vsel %vm737_vm7, %v732_v29, 0.0 }
 0x456   : > { %v741_v33 = vsel %vm400_vm6, %v739_v31, 0.0 }
 0x457   : > { %v740_v32 = vsel %vm738_vm8, %v733_v30, 0.0 }
 0x458   : > { %v742_v34 = vsel %vm400_vm6, %v740_v32, 0.0 }
 0x459   : > { %v743_v35 = vadd.f32 %v742_v34, %v741_v33 }
 0x45b   : > { %746 = vperm.xlu0 %891, %v743_v35  }
 0x4cd   : > { %v747_v37 = vpop.permute.xlu0 %746 }
 0x4ce   : > { %749 = vst [vmem:[%s273_s21] sm:$0x1] %v747_v37 }
 0x4cf   : > { %924 = shalt.err (!%p921_p3)
}
 0x4d0   : > { %845 = dma.vmem_to_hbm [thread:$0]  (%p1046_p5), %s762_s22, 16, %s764_s23, %s751_s24  }
 0x4d1 PF: > { %p851_p4 = scmp.ge.s32.totalorder %s959_s29, 2  ;;  %s775_s17 = sand.u32 1, %s947_s26  }
 0x4d2   : > { %s776_s14 = scalar_lea.sflag [#allocation4], %s775_s17 }
 0x4d3   : > { %p848_p7 = pnand %p851_p4, %p1050_p6 }
 0x4d5   : > { %p849_p8 = pneg %p848_p7 }
 0x4d7   : > { %942 = dma.done.wait (%p849_p8), %s776_s14, 16  }
 0x4d8   : > { %944 = vsyncadd (%p849_p8), %s776_s14, 4294967280  ;;  %p19_p9 = scmp.ge.s32.totalorder %s1033_s8, 4   ;;  %s1245_s26 = smov %s951_s27 }
 0x4d9   : > { %s1246_s27 = smov %s955_s28  ;;  %s1247_s28 = smov %s1044_s11 }
 0x4da   : > { %s1248_s29 = smov %s1033_s8  ;;  %21 = sbr.rel (!%p19_p9) target bundleno = 6 (0x6), region = 83 }
 0x4df   :  { %781 = vsyncpa [#allocation4], 1 }
 0x4e0   :  { %783 = vsyncpa [#allocation4 + $0x1], 1 }

</bundles_post_ra>
